<compile_context>
chip_gen: v6e
topology: v6e:2x2x1
jax: 0.10.0
libtpu: 0.0.40
codegen_flags: <defaults>
</compile_context>

<pallas_src>
import functools
import math

import jax
import jax.numpy as jnp
from jax.experimental import pallas as pl
from jax.experimental.pallas import tpu as pltpu

LANE = 128


def _round_up(n, m):
    return ((n + m - 1) // m) * m


def mlp_kernel(x_ref, w1_ref, w2_ref, w3_ref, o_ref, *, num_classes):
    # x arrives in f32 straight from HBM; cast to bf16 on the VPU (free under DMA slack)
    x = x_ref[...].astype(jnp.bfloat16)

    # fc1 -> relu   (bf16 operands, f32 accumulate on the MXU)
    h1 = jnp.dot(x, w1_ref[...], preferred_element_type=jnp.float32)
    h1 = jnp.maximum(h1, 0.0).astype(jnp.bfloat16)

    # fc2 -> relu
    h2 = jnp.dot(h1, w2_ref[...], preferred_element_type=jnp.float32)
    h2 = jnp.maximum(h2, 0.0).astype(jnp.bfloat16)

    # fc3 (logits in f32)
    logits = jnp.dot(h2, w3_ref[...], preferred_element_type=jnp.float32)

    # mask padded class lanes to -inf so the log-sum-exp only sees real classes
    lane = jax.lax.broadcasted_iota(jnp.int32, logits.shape, dimension=1)
    logits = jnp.where(lane < num_classes, logits, -jnp.inf)

    # log_softmax over the class dimension (dim=1 in PyTorch), f32 math
    m = jnp.max(logits, axis=-1, keepdims=True)
    shifted = logits - m
    lse = jnp.log(jnp.sum(jnp.exp(shifted), axis=-1, keepdims=True))
    o_ref[...] = (shifted - lse).astype(o_ref.dtype)


def prepare_weights(w1, w2, w3):
    """One-time (init-time) pad-to-128-lanes + bf16 cast of the parameters.

    w*: (in, out) float32 — the transpose of PyTorch's (out, in) layout.
    Hoisted out of the per-call forward (perf review item 5)."""
    def pad_cast(w):
        di, do = w.shape
        return jnp.pad(w.astype(jnp.bfloat16),
                       ((0, _round_up(di, LANE) - di),
                        (0, _round_up(do, LANE) - do)))
    return pad_cast(w1), pad_cast(w2), pad_cast(w3)


def mlpnet_forward(x_nchw, w1_p, w2_p, w3_p, *, num_classes,
                   tb_max=2048, out_dtype=jnp.bfloat16):
    """x_nchw: (B, ...) float32 -> flattened like x.view(B, -1).
    w*_p: padded bf16 weights from prepare_weights()."""
    B = x_nchw.shape[0]
    x2d = x_nchw.reshape(B, -1)
    D = x2d.shape[1]

    D_pad = w1_p.shape[0]
    H1_pad = w1_p.shape[1]
    H2_pad = w2_p.shape[1]
    NC_pad = w3_p.shape[1]
    assert D <= D_pad

    # batch tile: multiple of 16 sublanes, capped for VMEM (tb_max=2048 keeps the
    # f32 x tile at 8 MiB x2 double-buffered — comfortably inside v7x's 64 MiB too)
    TB = min(tb_max, _round_up(B, 16))
    # v7x megacore: make sure there are >= 2 grid tiles to shard across its 2 TCs
    if B > 16 and _round_up(B, TB) // TB < 2:
        TB = max(16, _round_up((B + 1) // 2, 16))
    B_pad = _round_up(B, TB)

    # pad x only when actually required (no pre-cast: the kernel casts to bf16)
    if (B_pad, D_pad) != (B, D):
        x_in = jnp.pad(x2d, ((0, B_pad - B), (0, D_pad - D)))
    else:
        x_in = x2d

    kernel = functools.partial(mlp_kernel, num_classes=num_classes)

    out = pl.pallas_call(
        kernel,
        out_shape=jax.ShapeDtypeStruct((B_pad, NC_pad), out_dtype),
        grid=(B_pad // TB,),
        in_specs=[
            pl.BlockSpec((TB, D_pad), lambda i: (i, 0)),        # streamed x tiles
            pl.BlockSpec((D_pad, H1_pad), lambda i: (0, 0)),    # weights VMEM-resident
            pl.BlockSpec((H1_pad, H2_pad), lambda i: (0, 0)),
            pl.BlockSpec((H2_pad, NC_pad), lambda i: (0, 0)),
        ],
        out_specs=pl.BlockSpec((TB, NC_pad), lambda i: (i, 0)),
        compiler_params=pltpu.CompilerParams(
            dimension_semantics=("parallel",),
            vmem_limit_bytes=64 * 1024 * 1024,
        ),
    )(x_in, w1_p, w2_p, w3_p)

    # drop padded batch rows and padded (-inf) class lanes
    return out[:B, :num_classes]


def init_params(key, input_size, h1=40, h2=20, num_classes=10):
    """Kaiming normal, mode='fan_out', nonlinearity='relu' => std = sqrt(2/out).
    PyTorch stores weight as (out, in); we store the transpose (in, out)."""
    k1, k2, k3 = jax.random.split(key, 3)

    def kaiming_fan_out(k, fan_in, fan_out):
        std = math.sqrt(2.0 / fan_out)
        w = jax.random.normal(k, (fan_out, fan_in), dtype=jnp.float32) * std
        return w.T

    w1 = kaiming_fan_out(k1, input_size, h1)
    w2 = kaiming_fan_out(k2, h1, h2)
    w3 = kaiming_fan_out(k3, h2, num_classes)
    return w1, w2, w3


if __name__ == "__main__":
    key = jax.random.PRNGKey(0)
    kx, kp = jax.random.split(key)

    # small NCHW input consistent with x.view(B, -1): B=2, C=4, H=W=16 -> D=1024
    B, C, H, W = 2, 4, 16, 16
    x = jax.random.normal(kx, (B, C, H, W), dtype=jnp.float32)

    input_size = C * H * W
    num_classes = 10
    w1, w2, w3 = init_params(kp, input_size, h1=40, h2=20, num_classes=num_classes)

    # init-time weight prep (padded + bf16), reused across forward calls
    w1_p, w2_p, w3_p = prepare_weights(w1, w2, w3)

    out = mlpnet_forward(x, w1_p, w2_p, w3_p, num_classes=num_classes)
    out = jax.block_until_ready(out)

    # reference in plain JAX following the same bf16-operand / f32-accumulate path
    x2d = x.reshape(B, -1)
    xb = x2d.astype(jnp.bfloat16)
    w1b = w1.astype(jnp.bfloat16)
    w2b = w2.astype(jnp.bfloat16)
    w3b = w3.astype(jnp.bfloat16)
    r = jnp.maximum(jnp.dot(xb, w1b, preferred_element_type=jnp.float32), 0.0)
    r = jnp.maximum(jnp.dot(r.astype(jnp.bfloat16), w2b,
                            preferred_element_type=jnp.float32), 0.0)
    logits = jnp.dot(r.astype(jnp.bfloat16), w3b,
                     preferred_element_type=jnp.float32)
    ref = jax.nn.log_softmax(logits, axis=1)

    assert out.shape == (B, num_classes)
    assert jnp.all(jnp.isfinite(out.astype(jnp.float32)))
    assert jnp.allclose(out.astype(jnp.float32), ref, atol=2e-2, rtol=2e-2)

    print("KERNEL_OK")
</pallas_src>

<mosaic_0001>
module attributes {stable_mosaic.version = 11 : i64} {
  func.func @mlp_kernel(%arg0: i32, %arg1: memref<16x1024xf32, #tpu.memory_space<vmem>>, %arg2: memref<1024x128xbf16, #tpu.memory_space<vmem>>, %arg3: memref<128x128xbf16, #tpu.memory_space<vmem>>, %arg4: memref<128x128xbf16, #tpu.memory_space<vmem>>, %arg5: memref<16x128xbf16, #tpu.memory_space<vmem>>) attributes {dimension_semantics = [#tpu.dimension_semantics<parallel>], iteration_bounds = array<i64: 1>, scalar_prefetch = 0 : i64, scratch_operands = 0 : i64, tpu.core_type = #tpu.core_type<tc>, window_params = [{transform_indices = @transform_0, window_bounds = array<i64: 16, 1024>}, {pipeline_mode = #tpu.pipeline_mode<synchronous>, transform_indices = @transform_1, window_bounds = array<i64: 1024, 128>}, {pipeline_mode = #tpu.pipeline_mode<synchronous>, transform_indices = @transform_2, window_bounds = array<i64: 128, 128>}, {pipeline_mode = #tpu.pipeline_mode<synchronous>, transform_indices = @transform_3, window_bounds = array<i64: 128, 128>}, {transform_indices = @transform_4, window_bounds = array<i64: 16, 128>}]} {
    %c0 = arith.constant 0 : index
    %c0_0 = arith.constant 0 : index
    %0 = vector.load %arg1[%c0, %c0_0] : memref<16x1024xf32, #tpu.memory_space<vmem>>, vector<16x1024xf32>
    %1 = arith.truncf %0 : vector<16x1024xf32> to vector<16x1024xbf16>
    %c0_1 = arith.constant 0 : index
    %c0_2 = arith.constant 0 : index
    %2 = vector.load %arg2[%c0_1, %c0_2] : memref<1024x128xbf16, #tpu.memory_space<vmem>>, vector<1024x128xbf16>
    %cst = arith.constant dense<0.000000e+00> : vector<16x128xf32>
    %3 = tpu.matmul %1, %2, %cst {dimension_numbers = #tpu.dot_dimension_numbers<[1], [0], [0], [1], [0, 0, 1, 1], [], []>} : vector<16x1024xbf16>, vector<1024x128xbf16>, vector<16x128xf32> -> vector<16x128xf32>
    %cst_3 = arith.constant 0.000000e+00 : f32
    %4 = vector.broadcast %cst_3 : f32 to vector<16x128xf32>
    %5 = arith.maximumf %3, %4 : vector<16x128xf32>
    %6 = arith.truncf %5 : vector<16x128xf32> to vector<16x128xbf16>
    %c0_4 = arith.constant 0 : index
    %c0_5 = arith.constant 0 : index
    %7 = vector.load %arg3[%c0_4, %c0_5] : memref<128x128xbf16, #tpu.memory_space<vmem>>, vector<128x128xbf16>
    %cst_6 = arith.constant dense<0.000000e+00> : vector<16x128xf32>
    %8 = tpu.matmul %6, %7, %cst_6 {dimension_numbers = #tpu.dot_dimension_numbers<[1], [0], [0], [1], [0, 0, 1, 1], [], []>} : vector<16x128xbf16>, vector<128x128xbf16>, vector<16x128xf32> -> vector<16x128xf32>
    %cst_7 = arith.constant 0.000000e+00 : f32
    %9 = vector.broadcast %cst_7 : f32 to vector<16x128xf32>
    %10 = arith.maximumf %8, %9 : vector<16x128xf32>
    %11 = arith.truncf %10 : vector<16x128xf32> to vector<16x128xbf16>
    %c0_8 = arith.constant 0 : index
    %c0_9 = arith.constant 0 : index
    %12 = vector.load %arg4[%c0_8, %c0_9] : memref<128x128xbf16, #tpu.memory_space<vmem>>, vector<128x128xbf16>
    %cst_10 = arith.constant dense<0.000000e+00> : vector<16x128xf32>
    %13 = tpu.matmul %11, %12, %cst_10 {dimension_numbers = #tpu.dot_dimension_numbers<[1], [0], [0], [1], [0, 0, 1, 1], [], []>} : vector<16x128xbf16>, vector<128x128xbf16>, vector<16x128xf32> -> vector<16x128xf32>
    %14 = tpu.iota {dimensions = array<i32: 1>} : vector<16x128xi32>
    %c10_i32 = arith.constant 10 : i32
    %15 = vector.broadcast %c10_i32 : i32 to vector<16x128xi32>
    %16 = arith.cmpi slt, %14, %15 : vector<16x128xi32>
    %cst_11 = arith.constant 0xFF800000 : f32
    %17 = vector.broadcast %cst_11 : f32 to vector<16x128xf32>
    %18 = arith.select %16, %13, %17 : vector<16x128xi1>, vector<16x128xf32>
    %cst_12 = arith.constant dense<0xFF800000> : vector<16xf32>
    %19 = vector.multi_reduction <maximumf>, %18, %cst_12 [1] : vector<16x128xf32> to vector<16xf32>
    %20 = vector.shape_cast %19 : vector<16xf32> to vector<16x1xf32>
    %21 = vector.broadcast %20 : vector<16x1xf32> to vector<16x128xf32>
    %22 = arith.subf %18, %21 : vector<16x128xf32>
    %23 = math.exp %22 : vector<16x128xf32>
    %cst_13 = arith.constant dense<0.000000e+00> : vector<16xf32>
    %24 = vector.multi_reduction <add>, %23, %cst_13 [1] : vector<16x128xf32> to vector<16xf32>
    %25 = vector.shape_cast %24 : vector<16xf32> to vector<16x1xf32>
    %26 = math.log %25 : vector<16x1xf32>
    %27 = vector.broadcast %26 : vector<16x1xf32> to vector<16x128xf32>
    %28 = arith.subf %22, %27 : vector<16x128xf32>
    %29 = arith.truncf %28 : vector<16x128xf32> to vector<16x128xbf16>
    %c0_14 = arith.constant 0 : index
    %c0_15 = arith.constant 0 : index
    %30 = vector.load %arg5[%c0_14, %c0_15] : memref<16x128xbf16, #tpu.memory_space<vmem>>, vector<16x128xbf16>
    tpu.vector_store %arg5[%c0_14, %c0_15], %29 {strides = array<i32>} : memref<16x128xbf16, #tpu.memory_space<vmem>>, vector<16x128xbf16>,
    return
  }
  func.func @transform_0(%arg0: i32) -> (i32, i32) {
    %c0_i32 = arith.constant 0 : i32
    %c0_i32_0 = arith.constant 0 : i32
    return %arg0, %c0_i32 : i32, i32
  }
  func.func @transform_1(%arg0: i32) -> (i32, i32) {
    %c0_i32 = arith.constant 0 : i32
    %c0_i32_0 = arith.constant 0 : i32
    %c0_i32_1 = arith.constant 0 : i32
    return %c0_i32, %c0_i32_0 : i32, i32
  }
  func.func @transform_2(%arg0: i32) -> (i32, i32) {
    %c0_i32 = arith.constant 0 : i32
    %c0_i32_0 = arith.constant 0 : i32
    %c0_i32_1 = arith.constant 0 : i32
    return %c0_i32, %c0_i32_0 : i32, i32
  }
  func.func @transform_3(%arg0: i32) -> (i32, i32) {
    %c0_i32 = arith.constant 0 : i32
    %c0_i32_0 = arith.constant 0 : i32
    %c0_i32_1 = arith.constant 0 : i32
    return %c0_i32, %c0_i32_0 : i32, i32
  }
  func.func @transform_4(%arg0: i32) -> (i32, i32) {
    %c0_i32 = arith.constant 0 : i32
    %c0_i32_0 = arith.constant 0 : i32
    return %arg0, %c0_i32 : i32, i32
  }
}

</mosaic_0001>

<bundles_post_ra>
// kernel: tpu_custom_call.1
= control target key start
LH: loop header
LB: loop body
LE: loop exit
PB: predicated region body
PF: predicated region fallthrough
CT: control target
= control target key end

     0   :  { %9 = vsyncpa [#allocation3], 0  ;;  %s1566_s0 = inlined_call_operand.hbm [shape: f32[16,1024], index: 0, kind: input, shape index: {}]   ;;  %s1567_s1 = inlined_call_operand.hbm [shape: bf16[1024,128], index: 1, kind: input, shape index: {}]   ;;  %s1568_s2 = inlined_call_operand.hbm [shape: bf16[128,128], index: 2, kind: input, shape index: {}]   ;;  %s1569_s3 = inlined_call_operand.hbm [shape: bf16[128,128], index: 3, kind: input, shape index: {}]   ;;  %s1570_s4 = inlined_call_operand.hbm [shape: bf16[16,128], index: 4, kind: output, shape index: {}]  }
   0x1   :  { %10 = vsyncpa [#allocation6], 0 }
   0x2   :  { %11 = vsyncpa [#allocation9], 0 }
   0x3   :  { %12 = vsyncpa [#allocation4], 0  ;;  %s1485_s15 = smov [#allocation5]  }
   0x4   :  { %s30_s16 = sshll.u32 %s1485_s15, 4  ;;  %s31_s16 = int_to_ptr.vmem [resolvable:$true] %s30_s16 }
   0x5   :  { %s1385_s17 = scalar_lea.vmem %s31_s16, 8192  ;;  %p1390_p1 = scmp.lt.s32.totalorder %s31_s16, %s31_s16 }
   0x6   :  { %p1386_p0 = scmp.ne.s32.totalorder %s31_s16, %s1385_s17  ;;  %p1391_p2 = scmp.lt.s32.totalorder %s1385_s17, %s1385_s17 }
   0x8   :  { %p1392_p3 = por %p1391_p2, %p1390_p1 }
   0xa   :  { %p1393_p4 = pnand %p1392_p3, %p1386_p0 }
   0xc   :  { %1396 = shalt.err (!%p1393_p4)
}
   0xd   :  { %s1486_s18 = smov 64   ;;  %s1487_s19 = smov 4  }
   0xe   :  { %36 = dma.hbm_to_vmem [thread:$0]  %s1567_s1, 8192, %s31_s16, [#allocation6], %s1486_s18, %s1486_s18, %s1487_s19  }
   0xf   :  { %s1488_s22 = smov [#allocation2]  }
  0x10   :  { %s18_s23 = sshll.u32 %s1488_s22, 4  ;;  %s19_s23 = int_to_ptr.vmem [resolvable:$true] %s18_s23 }
  0x11   :  { %s1405_s24 = scalar_lea.vmem %s19_s23, 2048  ;;  %p1410_p6 = scmp.lt.s32.totalorder %s19_s23, %s19_s23 }
  0x12   :  { %p1406_p5 = scmp.ne.s32.totalorder %s19_s23, %s1405_s24  ;;  %p1411_p7 = scmp.lt.s32.totalorder %s1405_s24, %s1405_s24 }
  0x14   :  { %p1412_p8 = por %p1411_p7, %p1410_p6 }
  0x16   :  { %p1413_p9 = pnand %p1412_p8, %p1406_p5 }
  0x18   :  { %1416 = shalt.err (!%p1413_p9)
}
  0x19   :  { %s1489_s25 = smov 1024   ;;  %s1490_s28 = smov [#allocation7]  }
  0x1a   :  { %24 = dma.hbm_to_vmem [thread:$0]  %s1566_s0, 2048, %s19_s23, [#allocation3], %s1489_s25, %s1489_s25, %s1486_s18  }
  0x1b   :  { %s42_s29 = sshll.u32 %s1490_s28, 4  ;;  %s1491_s1 = smov [#allocation8]   ;;  %s43_s29 = int_to_ptr.vmem [resolvable:$true] %s42_s29 }
  0x1c   :  { %s54_s30 = sshll.u32 %s1491_s1, 4  ;;  %s1425_s5 = scalar_lea.vmem %s43_s29, 1024  ;;  %s55_s30 = int_to_ptr.vmem [resolvable:$true] %s54_s30 }
  0x1d   :  { %p1426_p10 = scmp.ne.s32.totalorder %s43_s29, %s1425_s5  ;;  %p1430_p11 = scmp.lt.s32.totalorder %s43_s29, %s43_s29 }
  0x1e   :  { %p1431_p12 = scmp.lt.s32.totalorder %s1425_s5, %s1425_s5 }
  0x20   :  { %p1432_p13 = por %p1431_p12, %p1430_p11 }
  0x22   :  { %p1433_p0 = pnand %p1432_p13, %p1426_p10 }
  0x24   :  { %1436 = shalt.err (!%p1433_p0)
}
  0x25   :  { %48 = dma.hbm_to_vmem [thread:$0]  %s1568_s2, 1024, %s43_s29, [#allocation6], %s1486_s18, %s1486_s18, %s1487_s19  }
  0x26   :  { %s1445_s0 = scalar_lea.vmem %s55_s30, 1024  ;;  %p1450_p2 = scmp.lt.s32.totalorder %s55_s30, %s55_s30 }
  0x27   :  { %p1446_p1 = scmp.ne.s32.totalorder %s55_s30, %s1445_s0  ;;  %p1451_p3 = scmp.lt.s32.totalorder %s1445_s0, %s1445_s0 }
  0x29   :  { %p1452_p4 = por %p1451_p3, %p1450_p2 }
  0x2b   :  { %p1453_p5 = pnand %p1452_p4, %p1446_p1 }
  0x2d   :  { %1456 = shalt.err (!%p1453_p5)
}
  0x2e   :  { %60 = dma.hbm_to_vmem [thread:$0]  %s1569_s3, 1024, %s55_s30, [#allocation9], %s1486_s18, %s1486_s18, %s1487_s19  }
  0x2f   :  { %1477 = dma.done.wait [#allocation3], 2048  }
  0x30   :  { %1478 = vsyncadd [#allocation3], 4294965248 }
  0x31   :  { %1479 = dma.done.wait [#allocation6], 9216  }
  0x32   :  { %1480 = vsyncadd [#allocation6], 4294958080 }
  0x33   :  { %1481 = dma.done.wait [#allocation9], 1024  }
  0x34   :  { %1482 = vsyncadd [#allocation9], 4294966272  ;;  %v1289_v0 = vld [vmem:[#allocation5 + $0x78] sm:$0xff]   ;;  %v1293_v4 = vld [vmem:[#allocation5 + $0x70] sm:$0xff]   ;;  %vm1493_vm0 = vmmov 0   ;;  %s1494_s2 = smov [#allocation10]  }
  0x35   :  { %v1290_v1 = vld [vmem:[#allocation5 + $0xf8] sm:$0xff]   ;;  %1133 = vmatprep.subr.bf16.mxu0 %v1289_v0  ;;  %v1294_v5 = vld [vmem:[#allocation5 + $0xf0] sm:$0xff]   ;;  %v1297_v8 = vld [vmem:[#allocation5 + $0x68] sm:$0xff]   ;;  %s1030_s3 = sshll.u32 %s1494_s2, 4  ;;  %s1031_s3 = int_to_ptr.vmem [resolvable:$true] %s1030_s3 }
  0x36   :  { %v1291_v2 = vld [vmem:[#allocation5 + $0x38] sm:$0xff]   ;;  %1155 = vmatprep.subr.bf16.mxu1 %v1290_v1  ;;  %v1295_v6 = vld [vmem:[#allocation5 + $0x30] sm:$0xff]   ;;  %v1298_v9 = vld [vmem:[#allocation5 + $0xe8] sm:$0xff]   ;;  %s1457_s10 = scalar_lea.vmem %s1031_s3, 128  ;;  %p1462_p7 = scmp.lt.s32.totalorder %s1031_s3, %s1031_s3 }
  0x37   :  { %v1292_v3 = vld [vmem:[#allocation5 + $0xb8] sm:$0xff]   ;;  %1134 = vmatpush3.bf16.msra.mxu0 %v1291_v2  ;;  %v1296_v7 = vld [vmem:[#allocation5 + $0xb0] sm:$0xff]   ;;  %v1299_v10 = vld [vmem:[#allocation5 + $0x28] sm:$0xff]   ;;  %p1458_p6 = scmp.ne.s32.totalorder %s1031_s3, %s1457_s10  ;;  %p1463_p8 = scmp.lt.s32.totalorder %s1457_s10, %s1457_s10 }
  0x38   :  { %1156 = vmatpush3.bf16.msra.mxu1 %v1292_v3  ;;  %1135 = vmatprep.subr.bf16.mxu0 %v1293_v4  ;;  %v1300_v11 = vld [vmem:[#allocation5 + $0xa8] sm:$0xff]   ;;  %v1301_v12 = vld [vmem:[#allocation5 + $0x60] sm:$0xff]   ;;  %v1305_v16 = vld [vmem:[#allocation5 + $0x58] sm:$0xff]  }
  0x39   :  { %1157 = vmatprep.subr.bf16.mxu1 %v1294_v5  ;;  %v1302_v13 = vld [vmem:[#allocation5 + $0xe0] sm:$0xff]   ;;  %v1306_v17 = vld [vmem:[#allocation5 + $0xd8] sm:$0xff]   ;;  %v1309_v20 = vld [vmem:[#allocation5 + $0x50] sm:$0xff]   ;;  %p1464_p9 = por %p1463_p8, %p1462_p7 }
  0x3a   :  { %v1303_v14 = vld [vmem:[#allocation5 + $0x20] sm:$0xff]   ;;  %v1307_v18 = vld [vmem:[#allocation5 + $0x18] sm:$0xff]   ;;  %v1310_v21 = vld [vmem:[#allocation5 + $0xd0] sm:$0xff]  }
  0x3b   :  { %1136 = vmatpush3.bf16.msra.mxu0 %v1295_v6  ;;  %v1304_v15 = vld [vmem:[#allocation5 + $0xa0] sm:$0xff]   ;;  %v1308_v19 = vld [vmem:[#allocation5 + $0x98] sm:$0xff]   ;;  %v1311_v22 = vld [vmem:[#allocation5 + $0x10] sm:$0xff]   ;;  %p1465_p10 = pnand %p1464_p9, %p1458_p6 }
  0x3c   :  { %1158 = vmatpush3.bf16.msra.mxu1 %v1296_v7  ;;  %1137 = vmatprep.subr.bf16.mxu0 %v1297_v8  ;;  %v1312_v23 = vld [vmem:[#allocation5 + $0x90] sm:$0xff]   ;;  %v1313_v24 = vld [vmem:[#allocation5 + $0x48] sm:$0xff]   ;;  %v1317_v28 = vld [vmem:[#allocation5 + $0x40] sm:$0xff]  }
  0x3d   :  { %1159 = vmatprep.subr.bf16.mxu1 %v1298_v9  ;;  %v1314_v25 = vld [vmem:[#allocation5 + $0xc8] sm:$0xff]   ;;  %v1318_v29 = vld [vmem:[#allocation5 + $0xc0] sm:$0xff]   ;;  %v77_v34 = vld [vmem:[#allocation2 + $0x18] sm:$0xff] }
  0x3e   :  { %v1315_v26 = vld [vmem:[#allocation5 + $0x8] sm:$0xff]   ;;  %v1319_v30 = vld [vmem:[#allocation5] sm:$0xff]   ;;  %v85_v36 = vld [vmem:[#allocation2 + $0x58] sm:$0xff] }
  0x3f   :  { %1138 = vmatpush3.bf16.msra.mxu0 %v1299_v10  ;;  %v1316_v27 = vld [vmem:[#allocation5 + $0x88] sm:$0xff]   ;;  %v1320_v31 = vld [vmem:[#allocation5 + $0x80] sm:$0xff]   ;;  %v93_v39 = vpack.c.bf16 %v85_v36, %v77_v34  ;;  %v76_v41 = vld [vmem:[#allocation2 + $0x10] sm:$0xff] }
  0x40   :  { %1160 = vmatpush3.bf16.msra.mxu1 %v1300_v11  ;;  %1139 = vmatprep.subr.bf16.mxu0 %v1301_v12  ;;  %v75_v32 = vld [vmem:[#allocation2 + $0x8] sm:$0xff]  ;;  %v74_v37 = vld [vmem:[#allocation2] sm:$0xff]  ;;  %v84_v42 = vld [vmem:[#allocation2 + $0x50] sm:$0xff] }
  0x41   :  { %1161 = vmatprep.subr.bf16.mxu1 %v1302_v13  ;;  %v83_v33 = vld [vmem:[#allocation2 + $0x48] sm:$0xff]  ;;  %v82_v38 = vld [vmem:[#allocation2 + $0x40] sm:$0xff]  ;;  %v92_v43 = vpack.c.bf16 %v84_v42, %v76_v41  ;;  %v1321_v44 = vld [vmem:[#allocation5 + $0x178] sm:$0xff]   ;;  %683 = vmatprep.mubr.bf16.mxu1 %v93_v39 }
  0x42   :  { %v91_v35 = vpack.c.bf16 %v83_v33, %v75_v32  ;;  %v90_v40 = vpack.c.bf16 %v82_v38, %v74_v37  ;;  %v1322_v45 = vld [vmem:[#allocation5 + $0x1f8] sm:$0xff]   ;;  %v1325_v48 = vld [vmem:[#allocation5 + $0x170] sm:$0xff]   ;;  %v1329_v52 = vld [vmem:[#allocation5 + $0x168] sm:$0xff]  }
  0x43   :  { %1140 = vmatpush3.bf16.msra.mxu0 %v1303_v14  ;;  %v1323_v46 = vld [vmem:[#allocation5 + $0x138] sm:$0xff]   ;;  %v1326_v49 = vld [vmem:[#allocation5 + $0x1f0] sm:$0xff]   ;;  %v1330_v53 = vld [vmem:[#allocation5 + $0x1e8] sm:$0xff]  }
  0x44   :  { %1162 = vmatpush3.bf16.msra.mxu1 %v1304_v15  ;;  %1141 = vmatprep.subr.bf16.mxu0 %v1305_v16  ;;  %v1324_v47 = vld [vmem:[#allocation5 + $0x1b8] sm:$0xff]   ;;  %v1327_v50 = vld [vmem:[#allocation5 + $0x130] sm:$0xff]   ;;  %v1331_v54 = vld [vmem:[#allocation5 + $0x128] sm:$0xff]  }
  0x45   :  { %1163 = vmatprep.subr.bf16.mxu1 %v1306_v17  ;;  %642 = vmatprep.mubr.bf16.mxu0 %v91_v35  ;;  %v1328_v51 = vld [vmem:[#allocation5 + $0x1b0] sm:$0xff]   ;;  %v1332_v55 = vld [vmem:[#allocation5 + $0x1a8] sm:$0xff]   ;;  %v1333_v56 = vld [vmem:[#allocation5 + $0x160] sm:$0xff]  }
  0x46   :  { %v1334_v57 = vld [vmem:[#allocation5 + $0x1e0] sm:$0xff]   ;;  %v1337_v60 = vld [vmem:[#allocation5 + $0x158] sm:$0xff]   ;;  %v1341_v0 = vld [vmem:[#allocation5 + $0x150] sm:$0xff]  }
  0x47   :  { %1142 = vmatpush3.bf16.msra.mxu0 %v1307_v18  ;;  %v1335_v58 = vld [vmem:[#allocation5 + $0x120] sm:$0xff]   ;;  %v1338_v61 = vld [vmem:[#allocation5 + $0x1d8] sm:$0xff]   ;;  %v1342_v1 = vld [vmem:[#allocation5 + $0x1d0] sm:$0xff]  }
  0x48   :  { %1164 = vmatpush3.bf16.msra.mxu1 %v1308_v19  ;;  %1143 = vmatprep.subr.bf16.mxu0 %v1309_v20  ;;  %v1336_v59 = vld [vmem:[#allocation5 + $0x1a0] sm:$0xff]   ;;  %v1339_v62 = vld [vmem:[#allocation5 + $0x118] sm:$0xff]   ;;  %v1343_v2 = vld [vmem:[#allocation5 + $0x110] sm:$0xff]  }
  0x49   :  { %1165 = vmatprep.subr.bf16.mxu1 %v1310_v21  ;;  %v1340_v63 = vld [vmem:[#allocation5 + $0x198] sm:$0xff]   ;;  %v1344_v3 = vld [vmem:[#allocation5 + $0x190] sm:$0xff]   ;;  %v1345_v4 = vld [vmem:[#allocation5 + $0x148] sm:$0xff]  }
  0x4a   :  { %v1346_v5 = vld [vmem:[#allocation5 + $0x1c8] sm:$0xff]   ;;  %v1349_v8 = vld [vmem:[#allocation5 + $0x140] sm:$0xff]   ;;  %v81_v14 = vld [vmem:[#allocation2 + $0x38] sm:$0xff] }
  0x4b   :  { %1144 = vmatpush3.bf16.msra.mxu0 %v1311_v22  ;;  %v1347_v6 = vld [vmem:[#allocation5 + $0x108] sm:$0xff]   ;;  %v1350_v9 = vld [vmem:[#allocation5 + $0x1c0] sm:$0xff]   ;;  %v89_v15 = vld [vmem:[#allocation2 + $0x78] sm:$0xff] }
  0x4c   :  { %1166 = vmatpush3.bf16.msra.mxu1 %v1312_v23  ;;  %1145 = vmatprep.subr.bf16.mxu0 %v1313_v24  ;;  %v1348_v7 = vld [vmem:[#allocation5 + $0x188] sm:$0xff]   ;;  %v1351_v10 = vld [vmem:[#allocation5 + $0x100] sm:$0xff]   ;;  %v97_v17 = vpack.c.bf16 %v89_v15, %v81_v14  ;;  %v80_v20 = vld [vmem:[#allocation2 + $0x30] sm:$0xff] }
  0x4d   :  { %1167 = vmatprep.subr.bf16.mxu1 %v1314_v25  ;;  %v1352_v11 = vld [vmem:[#allocation5 + $0x180] sm:$0xff]   ;;  %v79_v12 = vld [vmem:[#allocation2 + $0x28] sm:$0xff]  ;;  %v88_v22 = vld [vmem:[#allocation2 + $0x70] sm:$0xff]  ;;  %v1492_v25 = vmov 0.0  }
  0x4e   :  { %v87_v13 = vld [vmem:[#allocation2 + $0x68] sm:$0xff]  ;;  %v78_v18 = vld [vmem:[#allocation2 + $0x20] sm:$0xff]  ;;  %v96_v23 = vpack.c.bf16 %v88_v22, %v80_v20  ;;  %v1353_v24 = vld [vmem:[#allocation7 + $0x38] sm:$0xff]  }
  0x4f   :  { %1146 = vmatpush3.bf16.msra.mxu0 %v1315_v26  ;;  %v95_v16 = vpack.c.bf16 %v87_v13, %v79_v12  ;;  %v86_v19 = vld [vmem:[#allocation2 + $0x60] sm:$0xff]  ;;  %v1354_v26 = vld [vmem:[#allocation7 + $0x30] sm:$0xff]   ;;  %v1361_v33 = vld [vmem:[#allocation8 + $0x38] sm:$0xff]  }
  0x50   :  { %1168 = vmatpush3.bf16.msra.mxu1 %v1316_v27  ;;  %1147 = vmatprep.subr.bf16.mxu0 %v1317_v28  ;;  %v94_v21 = vpack.c.bf16 %v86_v19, %v78_v18  ;;  %v1355_v27 = vld [vmem:[#allocation7 + $0x28] sm:$0xff]   ;;  %v1356_v28 = vld [vmem:[#allocation7 + $0x20] sm:$0xff]   ;;  %v1362_v34 = vld [vmem:[#allocation8 + $0x30] sm:$0xff]  }
  0x51   :  { %1169 = vmatprep.subr.bf16.mxu1 %v1318_v29  ;;  %v1357_v29 = vld [vmem:[#allocation7 + $0x18] sm:$0xff]   ;;  %v1360_v32 = vld [vmem:[#allocation7] sm:$0xff]   ;;  %v1363_v35 = vld [vmem:[#allocation8 + $0x28] sm:$0xff]  }
  0x52   :  { %v1364_v36 = vld [vmem:[#allocation8 + $0x20] sm:$0xff]   ;;  %v1365_v37 = vld [vmem:[#allocation8 + $0x18] sm:$0xff]   ;;  %v1366_v38 = vld [vmem:[#allocation8 + $0x10] sm:$0xff]  }
  0x53   :  { %1148 = vmatpush3.bf16.msra.mxu0 %v1319_v30  ;;  %v1358_v30 = vld [vmem:[#allocation7 + $0x10] sm:$0xff]  }
  0x54   :  { %1170 = vmatpush3.bf16.msra.mxu1 %v1320_v31  ;;  %1177 = vmatprep.subr.bf16.mxu0 %v1321_v44  ;;  %v1359_v31 = vld [vmem:[#allocation7 + $0x8] sm:$0xff]  }
  0x55   :  { %1199 = vmatprep.subr.bf16.mxu1 %v1322_v45 }
  0x56   :  { %643 = vmatmul.mubr.bf16.vlgmr.msra.gmra.mxu0 %v90_v40 }
  0x57   :  { %684 = vmatmul.mubr.bf16.vlgmr.msra.gmra.mxu1 %v92_v43  ;;  %1178 = vmatpush3.bf16.msra.mxu0 %v1323_v46 }
  0x58   :  { %1200 = vmatpush3.bf16.msra.mxu1 %v1324_v47  ;;  %1179 = vmatprep.subr.bf16.mxu0 %v1325_v48 }
  0x59   :  { %1201 = vmatprep.subr.bf16.mxu1 %v1326_v49  ;;  %724 = vmatprep.mubr.bf16.mxu0 %v95_v16 }
  0x5a   :  { %765 = vmatprep.mubr.bf16.mxu1 %v97_v17  ;;  %v990_v17 = vlaneseq }
  0x5b   :  { %1180 = vmatpush3.bf16.msra.mxu0 %v1327_v50 }
  0x5c   :  { %1202 = vmatpush3.bf16.msra.mxu1 %v1328_v51  ;;  %1181 = vmatprep.subr.bf16.mxu0 %v1329_v52  ;;  %v991_v18 = vand.u32 127, %v990_v17 }
  0x5d   :  { %1203 = vmatprep.subr.bf16.mxu1 %v1330_v53 }
  0x5e   :  { %vm992_vm1 = vcmp.lt.s32.totalorder %v991_v18, 10 }
  0x5f   :  { %1182 = vmatpush3.bf16.msra.mxu0 %v1331_v54 }
  0x60   :  { %1204 = vmatpush3.bf16.msra.mxu1 %v1332_v55  ;;  %1183 = vmatprep.subr.bf16.mxu0 %v1333_v56 }
  0x61   :  { %1205 = vmatprep.subr.bf16.mxu1 %v1334_v57 }
  0x63   :  { %1184 = vmatpush3.bf16.msra.mxu0 %v1335_v58 }
  0x64   :  { %1206 = vmatpush3.bf16.msra.mxu1 %v1336_v59  ;;  %1185 = vmatprep.subr.bf16.mxu0 %v1337_v60 }
  0x65   :  { %1207 = vmatprep.subr.bf16.mxu1 %v1338_v61 }
  0x67   :  { %1186 = vmatpush3.bf16.msra.mxu0 %v1339_v62 }
  0x68   :  { %1208 = vmatpush3.bf16.msra.mxu1 %v1340_v63  ;;  %1187 = vmatprep.subr.bf16.mxu0 %v1341_v0 }
  0x69   :  { %1209 = vmatprep.subr.bf16.mxu1 %v1342_v1 }
  0x6b   :  { %1188 = vmatpush3.bf16.msra.mxu0 %v1343_v2 }
  0x6c   :  { %1210 = vmatpush3.bf16.msra.mxu1 %v1344_v3  ;;  %1189 = vmatprep.subr.bf16.mxu0 %v1345_v4 }
  0x6d   :  { %1211 = vmatprep.subr.bf16.mxu1 %v1346_v5 }
  0x6f   :  { %1190 = vmatpush3.bf16.msra.mxu0 %v1347_v6 }
  0x70   :  { %1212 = vmatpush3.bf16.msra.mxu1 %v1348_v7  ;;  %1191 = vmatprep.subr.bf16.mxu0 %v1349_v8  ;;  %v1367_v8 = vld [vmem:[#allocation8 + $0x8] sm:$0xff]  }
  0x71   :  { %1213 = vmatprep.subr.bf16.mxu1 %v1350_v9  ;;  %v1368_v9 = vld [vmem:[#allocation8] sm:$0xff]  }
  0x73   :  { %1192 = vmatpush3.bf16.msra.mxu0 %v1351_v10 }
  0x74   :  { %1214 = vmatpush3.bf16.msra.mxu1 %v1352_v11  ;;  %1239 = vmatprep.subr.bf16.mxu0 %v1492_v25 }
  0x75   :  { %1259 = vmatprep.subr.bf16.mxu1 %v1492_v25 }
  0x76   :  { %725 = vmatmul.mubr.bf16.vlgmr.msra.gmra.mxu0 %v94_v21 }
  0x77   :  { %766 = vmatmul.mubr.bf16.vlgmr.msra.gmra.mxu1 %v96_v23  ;;  %1240 = vmatpush3.bf16.msra.mxu0 %v1353_v24 }
  0x78   :  { %1241 = vmatprep.subr.bf16.mxu0 %v1492_v25  ;;  %1255 = vmatprep.mubr.msk.bf16.mxu0 %vm1493_vm0, %v1492_v25 }
  0x79   :  { %1275 = vmatprep.mubr.msk.bf16.mxu1 %vm1493_vm0, %v1492_v25  ;;  %1260 = vmatpush3.bf16.msra.mxu1 %v1361_v33 }
  0x7a   :  { %1261 = vmatprep.subr.bf16.mxu1 %v1492_v25 }
  0x7b   :  { %1242 = vmatpush3.bf16.msra.mxu0 %v1354_v26 }
  0x7c   :  { %1243 = vmatprep.subr.bf16.mxu0 %v1492_v25 }
  0x7d   :  { %1262 = vmatpush3.bf16.msra.mxu1 %v1362_v34 }
  0x7e   :  { %1263 = vmatprep.subr.bf16.mxu1 %v1492_v25 }
  0x7f   :  { %1244 = vmatpush3.bf16.msra.mxu0 %v1355_v27 }
  0x80   :  { %1245 = vmatprep.subr.bf16.mxu0 %v1492_v25 }
  0x81   :  { %1264 = vmatpush3.bf16.msra.mxu1 %v1363_v35 }
  0x82   :  { %1265 = vmatprep.subr.bf16.mxu1 %v1492_v25 }
  0x83   :  { %1246 = vmatpush3.bf16.msra.mxu0 %v1356_v28 }
  0x84   :  { %1247 = vmatprep.subr.bf16.mxu0 %v1492_v25 }
  0x85   :  { %1266 = vmatpush3.bf16.msra.mxu1 %v1364_v36 }
  0x86   :  { %1267 = vmatprep.subr.bf16.mxu1 %v1492_v25 }
  0x87   :  { %1248 = vmatpush3.bf16.msra.mxu0 %v1357_v29 }
  0x88   :  { %1249 = vmatprep.subr.bf16.mxu0 %v1492_v25 }
  0x89   :  { %1268 = vmatpush3.bf16.msra.mxu1 %v1365_v37 }
  0x8a   :  { %1269 = vmatprep.subr.bf16.mxu1 %v1492_v25 }
  0x8b   :  { %1250 = vmatpush3.bf16.msra.mxu0 %v1358_v30 }
  0x8c   :  { %1251 = vmatprep.subr.bf16.mxu0 %v1492_v25 }
  0x8d   :  { %1270 = vmatpush3.bf16.msra.mxu1 %v1366_v38 }
  0x8e   :  { %1271 = vmatprep.subr.bf16.mxu1 %v1492_v25 }
  0x8f   :  { %1252 = vmatpush3.bf16.msra.mxu0 %v1359_v31 }
  0x90   :  { %1253 = vmatprep.subr.bf16.mxu0 %v1492_v25 }
  0x91   :  { %1272 = vmatpush3.bf16.msra.mxu1 %v1367_v8 }
  0x92   :  { %1273 = vmatprep.subr.bf16.mxu1 %v1492_v25 }
  0x93   :  { %1254 = vmatpush3.bf16.msra.mxu0 %v1360_v32 }
  0x95   :  { %1274 = vmatpush3.bf16.msra.mxu1 %v1368_v9 }
 0x116   :  { %v1149_v39 = vpop.f32.mrf.mxu0 }
 0x117   :  { %v1171_v40 = vpop.f32.mrf.mxu1 }
 0x118   :  { %v1150_v41 = vpop.f32.mrf.mxu0 }
 0x119   :  { %v1172_v42 = vpop.f32.mrf.mxu1  ;;  %v1151_v46 = vadd.f32 %v1150_v41, %v1149_v39 }
 0x11a   :  { %v1152_v43 = vpop.f32.mrf.mxu0  ;;  %v1173_v47 = vadd.f32 %v1172_v42, %v1171_v40 }
 0x11b   :  { %v1174_v44 = vpop.f32.mrf.mxu1 }
 0x11c   :  { %v1153_v45 = vpop.f32.mrf.mxu0  ;;  %v686_v52 = vadd.f32 %v1173_v47, %v1151_v46 }
 0x11d   :  { %v1175_v48 = vpop.f32.mrf.mxu1  ;;  %v1154_v53 = vadd.f32 %v1153_v45, %v1152_v43 }
 0x11e   :  { %v1176_v54 = vadd.f32 %v1175_v48, %v1174_v44 }
 0x120   :  { %v689_v61 = vadd.f32 %v1176_v54, %v1154_v53 }
 0x136   :  { %v1193_v49 = vpop.f32.mrf.mxu0 }
 0x137   :  { %v1215_v50 = vpop.f32.mrf.mxu1 }
 0x138   :  { %v1194_v51 = vpop.f32.mrf.mxu0 }
 0x139   :  { %v1195_v55 = vadd.f32 %v1194_v51, %v1193_v49  ;;  %v1216_v56 = vpop.f32.mrf.mxu1 }
 0x13a   :  { %v1196_v57 = vpop.f32.mrf.mxu0  ;;  %v1217_v62 = vadd.f32 %v1216_v56, %v1215_v50 }
 0x13b   :  { %v727_v58 = vadd.f32 %v1195_v55, %v686_v52  ;;  %v1218_v59 = vpop.f32.mrf.mxu1 }
 0x13c   :  { %v1197_v60 = vpop.f32.mrf.mxu0 }
 0x13d   :  { %v1198_v63 = vadd.f32 %v1197_v60, %v1196_v57  ;;  %v1219_v0 = vpop.f32.mrf.mxu1  ;;  %v768_v1 = vadd.f32 %v1217_v62, %v727_v58 }
 0x13e   :  { %v1220_v3 = vadd.f32 %v1219_v0, %v1218_v59 }
 0x13f   :  { %v730_v2 = vadd.f32 %v1198_v63, %v689_v61  ;;  %v774_v5 = vmax.f32 %v768_v1, 0.0 }
 0x141   :  { %v771_v4 = vadd.f32 %v1220_v3, %v730_v2 }
 0x143   :  { %v775_v6 = vmax.f32 %v771_v4, 0.0 }
 0x145   :  { %v776_v7 = vpack.c.bf16 %v775_v6, %v774_v5 }
 0x147   :  { %1256 = vmatmul.mubr.bf16.vlgmr.msra.gmra.mxu0 %v776_v7 }
 0x207   :  { %v875_v10 = vpop.f32.mrf.mxu0 }
 0x208   :  { %v882_v13 = vmax.f32 %v875_v10, 0.0 }
 0x209   :  { %v1257_v11 = vpop.f32.mrf.mxu0 }
 0x20b   :  { %v878_v12 = vpop.f32.mrf.mxu0 }
 0x20c   :  { %v883_v14 = vmax.f32 %v878_v12, 0.0 }
 0x20d   :  { %v1258_v15 = vpop.f32.mrf.mxu0 }
 0x20e   :  { %v884_v16 = vpack.c.bf16 %v883_v14, %v882_v13 }
 0x210   :  { %1276 = vmatmul.mubr.bf16.vlgmr.msra.gmra.mxu1 %v884_v16 }
 0x2d0   :  { %v983_v19 = vpop.f32.mrf.mxu1 }
 0x2d1   :  { %v993_v20 = vsel %vm992_vm1, %v983_v19, -inf }
 0x2d2   :  { %995 = vmax.xlane.f32.xlu0 %v993_v20  ;;  %v1277_v21 = vpop.f32.mrf.mxu1 }
 0x2d4   :  { %v986_v22 = vpop.f32.mrf.mxu1 }
 0x2d5   :  { %v994_v23 = vsel %vm992_vm1, %v986_v22, -inf }
 0x2d6   :  { %997 = vmax.xlane.f32.xlu0 %v994_v23  ;;  %v1278_v24 = vpop.f32.mrf.mxu1 }
 0x35b   :  { %v996_v25 = vpop.xlane.xlu0 %995 }
 0x35c   :  { %v999_v26 = vsub.f32 %v993_v20, %v996_v25 }
 0x35e   :  { %v1001_v27 = vmul.f32 1.442695, %v999_v26 }
 0x35f   :  { %v998_v28 = vpop.xlane.xlu0 %997 }
 0x360   :  { %v1000_v29 = vsub.f32 %v994_v23, %v998_v28  ;;  %1369 = vpow2.f32 %v1001_v27 }
 0x362   :  { %v1003_v30 = vmul.f32 1.442695, %v1000_v29 }
 0x364   :  { %1371 = vpow2.f32 %v1003_v30 }
 0x36d   :  { %v1370_v31 = vpop.eup %1369 }
 0x36e   :  { %1005 = vadd.xlane.f32.xlu1 %v1370_v31 }
 0x371   :  { %v1372_v32 = vpop.eup %1371 }
 0x372   :  { %1007 = vadd.xlane.f32.xlu1 %v1372_v32 }
 0x3f7   :  { %v1006_v33 = vpop.xlane.xlu1 %1005 }
 0x3f8   :  { %1373 = vlog2.f32 %v1006_v33 }
 0x3fb   :  { %v1008_v34 = vpop.xlane.xlu1 %1007 }
 0x3fc   :  { %1375 = vlog2.f32 %v1008_v34 }
 0x405   :  { %v1374_v35 = vpop.eup %1373 }
 0x406   :  { %v1010_v36 = vmul.f32 0.6931472, %v1374_v35 }
 0x408   :  { %v1013_v40 = vsub.f32 %v999_v26, %v1010_v36 }
 0x409   :  { %v1376_v37 = vpop.eup %1375 }
 0x40a   :  { %v1012_v38 = vmul.f32 0.6931472, %v1376_v37 }
 0x40c   :  { %v1014_v39 = vsub.f32 %v1000_v29, %v1012_v38 }
 0x40e   :  { %v1131_v41 = vpack.c.bf16 %v1014_v39, %v1013_v40 }
 0x410   :  { %1132 = vst [vmem:[#allocation10] sm:$0xff] %v1131_v41  }
 0x411   :  { %1468 = shalt.err (!%p1465_p10)
}
 0x412   :  { %1036 = dma.vmem_to_hbm [thread:$0]  %s1031_s3, 128, %s1570_s4, [#allocation4], %s1486_s18, %s1486_s18, %s1487_s19  }
 0x413   :  { %1483 = dma.done.wait [#allocation4], 128  }
 0x414   :  { %1484 = vsyncadd [#allocation4], 4294967168 }
 0x415   :  { %1040 = vsyncpa [#allocation3], 1 }
 0x416   :  { %1041 = vsyncpa [#allocation6], 1 }
 0x417   :  { %1042 = vsyncpa [#allocation9], 1 }
 0x418   :  { %1043 = vsyncpa [#allocation4], 1 }

</bundles_post_ra>
